<compile_context>
chip_gen: v6e
topology: v6e:2x2x1
jax: 0.10.0
libtpu: 0.0.40
codegen_flags: <defaults>
</compile_context>

<pallas_src>
import functools

import jax
import jax.numpy as jnp
from jax.experimental import pallas as pl
from jax.experimental.pallas import tpu as pltpu


def _focal_kernel(logits_ref, target_ref, loss_ref, *, gamma):
    x = logits_ref[...].astype(jnp.float32)                   # (TN, C)
    tgt = target_ref[...]                                      # (TN, 1) int32

    # Gather target logit via lane-iota one-hot mask (no full log-softmax tile).
    col = jax.lax.broadcasted_iota(jnp.int32, x.shape, 1)      # class indices
    onehot = col == tgt                                        # (TN,1)->(TN,C)
    x_t = jnp.sum(jnp.where(onehot, x, 0.0), axis=-1, keepdims=True)   # (TN, 1)

    # Stable log-sum-exp over the class (lane) dim.
    m = jnp.max(x, axis=-1, keepdims=True)
    lse = jnp.log(jnp.sum(jnp.exp(x - m), axis=-1, keepdims=True)) + m
    logpt = x_t - lse                                          # (TN, 1)

    pt = jnp.exp(logpt)
    one_minus_pt = 1.0 - pt                                    # in [0, 1)

    # Static gamma specialization (gamma is a Python float at trace time).
    g = float(gamma)
    if g == 0.0:
        w = None
    elif g.is_integer() and 1.0 <= g <= 4.0:
        w = one_minus_pt
        for _ in range(int(g) - 1):
            w = w * one_minus_pt
    else:
        w = jnp.power(one_minus_pt, g)

    loss = -logpt if w is None else -(w * logpt)
    loss_ref[...] = loss


def focal_loss(logits, target, gamma: float = 0.0, reduction: str = "mean"):
    if reduction not in ("mean", "sum", "none"):
        raise NotImplementedError
    N, C = logits.shape
    itemsize = jnp.dtype(logits.dtype).itemsize

    # VMEM-budgeted row tile: keep the double-buffered logits tile <= ~16 MiB
    # (conservative for v7x's 64 MiB physical VMEM; plenty of room on v5e/v6e).
    tile_bytes_budget = 8 * 1024 * 1024
    tn = tile_bytes_budget // max(1, C * itemsize)
    tn = max(8, min(1024, (tn // 8) * 8))
    n_pad8 = ((N + 7) // 8) * 8
    TN = min(tn, n_pad8)
    N_pad = ((N + TN - 1) // TN) * TN
    grid = (N_pad // TN,)

    if N_pad != N:
        logits = jnp.pad(logits, ((0, N_pad - N), (0, 0)))
        target = jnp.pad(target, ((0, N_pad - N),))
    target2 = target.reshape(N_pad, 1).astype(jnp.int32)

    kernel = functools.partial(_focal_kernel, gamma=float(gamma))

    out = pl.pallas_call(
        kernel,
        out_shape=jax.ShapeDtypeStruct((N_pad, 1), jnp.float32),
        grid_spec=pltpu.PrefetchScalarGridSpec(
            num_scalar_prefetch=0,
            grid=grid,
            in_specs=[
                pl.BlockSpec((TN, C), lambda i: (i, 0)),   # logits row tile
                pl.BlockSpec((TN, 1), lambda i: (i, 0)),   # target row tile
            ],
            out_specs=pl.BlockSpec((TN, 1), lambda i: (i, 0)),
        ),
        compiler_params=pltpu.CompilerParams(
            dimension_semantics=("parallel",),
            vmem_limit_bytes=40 * 1024 * 1024,
        ),
    )(logits, target2)

    loss = out[:N, 0]                      # drop padded rows before reducing
    if reduction == "mean":
        return jnp.mean(loss)              # divisor is the true N
    elif reduction == "sum":
        return jnp.sum(loss)
    return loss


def _focal_loss_ref(logits, target, gamma=0.0, reduction="mean"):
    """Plain-JAX reference mirroring the PyTorch module."""
    logp = jax.nn.log_softmax(logits.astype(jnp.float32), axis=-1)
    logpt = jnp.take_along_axis(logp, target.reshape(-1, 1), axis=1).reshape(-1)
    pt = jnp.exp(logpt)
    loss = -1.0 * (1.0 - pt) ** gamma * logpt
    if reduction == "mean":
        return loss.mean()
    elif reduction == "sum":
        return loss.sum()
    return loss


if __name__ == "__main__":
    key = jax.random.PRNGKey(0)
    k1, k2, k3, k4 = jax.random.split(key, 4)

    ok = True

    # Case 1: small (batch, num_classes), batch a multiple of 8.
    N, C = 16, 32
    logits = jax.random.normal(k1, (N, C), dtype=jnp.float32)
    target = jax.random.randint(k2, (N,), 0, C, dtype=jnp.int32)
    for gamma, reduction in [(0.0, "mean"), (2.0, "mean"), (2.0, "sum"),
                             (2.0, "none"), (1.5, "mean")]:
        got = jax.block_until_ready(focal_loss(logits, target, gamma, reduction))
        want = _focal_loss_ref(logits, target, gamma, reduction)
        ok &= bool(jnp.allclose(got, want, atol=1e-5, rtol=1e-5))

    # Case 2: batch NOT a multiple of 8 (exercises padding + masking path).
    N2, C2 = 13, 24
    logits2 = jax.random.normal(k3, (N2, C2), dtype=jnp.float32)
    target2 = jax.random.randint(k4, (N2,), 0, C2, dtype=jnp.int32)
    for gamma, reduction in [(2.0, "mean"), (2.0, "sum"), (0.0, "none")]:
        got = jax.block_until_ready(focal_loss(logits2, target2, gamma, reduction))
        want = _focal_loss_ref(logits2, target2, gamma, reduction)
        ok &= bool(jnp.allclose(got, want, atol=1e-5, rtol=1e-5))

    print("KERNEL_OK" if ok else "KERNEL_MISMATCH")
</pallas_src>

<mosaic_0001>
module attributes {stable_mosaic.version = 11 : i64} {
  func.func @_focal_kernel(%arg0: i32, %arg1: memref<16x32xf32, #tpu.memory_space<vmem>>, %arg2: memref<16x1xi32, #tpu.memory_space<vmem>>, %arg3: memref<16x1xf32, #tpu.memory_space<vmem>>) attributes {dimension_semantics = [#tpu.dimension_semantics<parallel>], iteration_bounds = array<i64: 1>, scalar_prefetch = 0 : i64, scratch_operands = 0 : i64, tpu.core_type = #tpu.core_type<tc>, window_params = [{transform_indices = @transform_0, window_bounds = array<i64: 16, 32>}, {transform_indices = @transform_1, window_bounds = array<i64: 16, 1>}, {transform_indices = @transform_2, window_bounds = array<i64: 16, 1>}]} {
    %c0 = arith.constant 0 : index
    %c0_0 = arith.constant 0 : index
    %0 = vector.load %arg1[%c0, %c0_0] : memref<16x32xf32, #tpu.memory_space<vmem>>, vector<16x32xf32>
    %c0_1 = arith.constant 0 : index
    %c0_2 = arith.constant 0 : index
    %1 = vector.load %arg2[%c0_1, %c0_2] : memref<16x1xi32, #tpu.memory_space<vmem>>, vector<16x1xi32>
    %2 = tpu.iota {dimensions = array<i32: 1>} : vector<16x32xi32>
    %3 = vector.broadcast %1 : vector<16x1xi32> to vector<16x32xi32>
    %4 = arith.cmpi eq, %2, %3 : vector<16x32xi32>
    %cst = arith.constant 0.000000e+00 : f32
    %5 = vector.broadcast %cst : f32 to vector<16x32xf32>
    %6 = arith.select %4, %0, %5 : vector<16x32xi1>, vector<16x32xf32>
    %cst_3 = arith.constant dense<0.000000e+00> : vector<16xf32>
    %7 = vector.multi_reduction <add>, %6, %cst_3 [1] : vector<16x32xf32> to vector<16xf32>
    %8 = vector.shape_cast %7 : vector<16xf32> to vector<16x1xf32>
    %cst_4 = arith.constant dense<0xFF800000> : vector<16xf32>
    %9 = vector.multi_reduction <maximumf>, %0, %cst_4 [1] : vector<16x32xf32> to vector<16xf32>
    %10 = vector.shape_cast %9 : vector<16xf32> to vector<16x1xf32>
    %11 = vector.broadcast %10 : vector<16x1xf32> to vector<16x32xf32>
    %12 = arith.subf %0, %11 : vector<16x32xf32>
    %13 = math.exp %12 : vector<16x32xf32>
    %cst_5 = arith.constant dense<0.000000e+00> : vector<16xf32>
    %14 = vector.multi_reduction <add>, %13, %cst_5 [1] : vector<16x32xf32> to vector<16xf32>
    %15 = vector.shape_cast %14 : vector<16xf32> to vector<16x1xf32>
    %16 = math.log %15 : vector<16x1xf32>
    %17 = arith.addf %16, %10 : vector<16x1xf32>
    %18 = arith.subf %8, %17 : vector<16x1xf32>
    %cst_6 = arith.constant 0.000000e+00 : f32
    %19 = vector.broadcast %cst_6 : f32 to vector<16x1xf32>
    %20 = arith.subf %19, %18 : vector<16x1xf32>
    %c0_7 = arith.constant 0 : index
    %c0_8 = arith.constant 0 : index
    %21 = vector.load %arg3[%c0_7, %c0_8] : memref<16x1xf32, #tpu.memory_space<vmem>>, vector<16x1xf32>
    tpu.vector_store %arg3[%c0_7, %c0_8], %20 {strides = array<i32>} : memref<16x1xf32, #tpu.memory_space<vmem>>, vector<16x1xf32>,
    return
  }
  func.func @transform_0(%arg0: i32) -> (i32, i32) {
    %c0_i32 = arith.constant 0 : i32
    %c0_i32_0 = arith.constant 0 : i32
    return %arg0, %c0_i32 : i32, i32
  }
  func.func @transform_1(%arg0: i32) -> (i32, i32) {
    %c0_i32 = arith.constant 0 : i32
    %c0_i32_0 = arith.constant 0 : i32
    return %arg0, %c0_i32 : i32, i32
  }
  func.func @transform_2(%arg0: i32) -> (i32, i32) {
    %c0_i32 = arith.constant 0 : i32
    %c0_i32_0 = arith.constant 0 : i32
    return %arg0, %c0_i32 : i32, i32
  }
}

</mosaic_0001>

<bundles_post_ra>
// kernel: tpu_custom_call.1
= control target key start
LH: loop header
LB: loop body
LE: loop exit
PB: predicated region body
PF: predicated region fallthrough
CT: control target
= control target key end

     0   :  { %vm27_vm0 = vcmask 261120   ;;  %v80_v2 = vmov 0   ;;  %v15_v13 = vlaneseq  ;;  %vm62_vm3 = vcmask 7168   ;;  %s120_s0 = inlined_call_operand.vmem [shape: f32[16,32], index: 0, kind: input, shape index: {}]   ;;  %s121_s1 = inlined_call_operand.vmem [shape: s32[16,1], index: 1, kind: input, shape index: {}]   ;;  %s122_s2 = inlined_call_operand.vmem [shape: f32[16,1], index: 2, kind: output, shape index: {}]  }
   0x1   :  { %v11_v0 = vld [vmem:[%s120_s0] sm:$0xff]  ;;  %v12_v1 = vld [vmem:[%s120_s0 + $0x8] sm:$0xff]  ;;  %70 = vset.pattern.permute.xlu1 %v80_v2  ;;  %71 = vset.pattern.permute.xlu0 %v80_v2 }
   0x2   :  { %v13_v3 = vld [vmem:[%s121_s1] sm:$0xff]  ;;  %v34_v4 = vsel %vm27_vm0, %v11_v0, -inf  ;;  %v14_v5 = vld [vmem:[%s121_s1 + $0x8] sm:$0xff]  ;;  %v37_v6 = vsel %vm27_vm0, %v12_v1, -inf  ;;  %v16_v15 = vand.u32 127, %v15_v13 }
   0x3   :  { %18 = vperm.xlu1 %70, %v13_v3   ;;  %35 = vmax.xlane.f32.xlu0 %v34_v4 }
   0x7   :  { %21 = vperm.xlu1 %70, %v14_v5   ;;  %38 = vmax.xlane.f32.xlu0 %v37_v6 }
  0x7e   :  { %v19_v14 = vpop.permute.xlu1 %18 }
  0x7f   :  { %vm23_vm1 = vcmp.eq.s32.totalorder %v16_v15, %v19_v14 }
  0x80   :  { %v25_v18 = vsel %vm23_vm1, %v11_v0, 0.0 }
  0x81   :  { %v28_v20 = vsel %vm27_vm0, %v25_v18, 0.0 }
  0x82   :  { %v22_v16 = vpop.permute.xlu1 %21 }
  0x83   :  { %vm24_vm2 = vcmp.eq.s32.totalorder %v16_v15, %v22_v16 }
  0x84   :  { %v26_v22 = vsel %vm24_vm2, %v12_v1, 0.0 }
  0x85   :  { %v31_v24 = vsel %vm27_vm0, %v26_v22, 0.0 }
  0x8c   :  { %v36_v7 = vpop.xlane.xlu0 %35 }
  0x8d   :  { %v40_v8 = vsub.f32 %v11_v0, %v36_v7 }
  0x8f   :  { %v42_v9 = vmul.f32 1.442695, %v40_v8 }
  0x90   :  { %v39_v10 = vpop.xlane.xlu0 %38 }
  0x91   :  { %72 = vpow2.f32 %v42_v9  ;;  %v41_v11 = vsub.f32 %v12_v1, %v39_v10 }
  0x93   :  { %v44_v12 = vmul.f32 1.442695, %v41_v11 }
  0x95   :  { %74 = vpow2.f32 %v44_v12 }
  0x9e   :  { %v73_v17 = vpop.eup %72 }
  0x9f   :  { %v46_v19 = vsel %vm27_vm0, %v73_v17, 0.0 }
  0xa0   :  { %47 = vadd.xlane.f32.xlu0 %v46_v19 }
  0xa2   :  { %v75_v21 = vpop.eup %74 }
  0xa3   :  { %v49_v23 = vsel %vm27_vm0, %v75_v21, 0.0 }
  0xa4   :  { %50 = vadd.xlane.f32.xlu1 %v49_v23  ;;  %29 = vadd.xlane.f32.xlu0 %v28_v20 }
  0xa8   :  { %32 = vadd.xlane.f32.xlu0 %v31_v24 }
 0x129   :  { %v48_v25 = vpop.xlane.xlu0 %47 }
 0x12a   :  { %76 = vlog2.f32 %v48_v25 }
 0x12d   :  { %v51_v26 = vpop.xlane.xlu1 %50  ;;  %v30_v29 = vpop.xlane.xlu0 %29 }
 0x12e   :  { %78 = vlog2.f32 %v51_v26 }
 0x131   :  { %v33_v36 = vpop.xlane.xlu0 %32 }
 0x137   :  { %v77_v27 = vpop.eup %76 }
 0x138   :  { %v53_v28 = vmul.f32 0.6931472, %v77_v27 }
 0x13a   :  { %v56_v30 = vadd.f32 %v53_v28, %v36_v7 }
 0x13b   :  { %v79_v31 = vpop.eup %78 }
 0x13c   :  { %v55_v32 = vmul.f32 0.6931472, %v79_v31  ;;  %v58_v33 = vsub.f32 %v30_v29, %v56_v30 }
 0x13e   :  { %v60_v34 = vsub.f32 0.0, %v58_v33  ;;  %v57_v35 = vadd.f32 %v55_v32, %v39_v10 }
 0x140   :  { %63 = vst.msk [vmem:[%s122_s2] sm:$0xff] %vm62_vm3, %v60_v34  ;;  %v59_v37 = vsub.f32 %v33_v36, %v57_v35 }
 0x142   :  { %v61_v38 = vsub.f32 0.0, %v59_v37 }
 0x144   :  { %64 = vst.msk [vmem:[%s122_s2 + $0x8] sm:$0xff] %vm62_vm3, %v61_v38 }

</bundles_post_ra>
